<compile_context>
chip_gen: v7x
topology: tpu7x:2x2x1
jax: 0.10.0
libtpu: 0.0.40
codegen_flags: <defaults>
</compile_context>

<pallas_src>
import functools

import jax
import jax.numpy as jnp
from jax.experimental import pallas as pl
from jax.experimental.pallas import tpu as pltpu


# TODO(synk): the reference's ACTIVATIONS registry is not provided; expose a
# few common choices (PyTorch nn.GELU default is exact erf, so approximate=False).
_ACTIVATIONS = {
    "relu": lambda x: jnp.maximum(x, 0.0),
    "tanh": jnp.tanh,
    "gelu": lambda x: jax.nn.gelu(x, approximate=False),
    "sigmoid": jax.nn.sigmoid,
    "identity": lambda x: x,
}


def _round_up(x, m):
    return ((x + m - 1) // m) * m


def _sublane_align(dtype):
    """Sublane alignment for the second-to-last dim, by element width."""
    return {4: 8, 2: 16, 1: 32}.get(jnp.dtype(dtype).itemsize, 8)


def _fused_mlp_kernel(*refs, n_layers, act_fn):
    """One (bm, N_out) row-block of the whole MLP stack.

    refs = (x, w_0..w_{L-1}, affine_0..affine_{L-1}, out) where affine_l is a
    (2, N_l) f32 array with row 0 = per-column scale (weight_norm, or ones)
    and row 1 = bias. All matmuls accumulate in f32 on the MXU; the scale,
    bias and activation are applied in f32; intermediates stay in VMEM/vregs.
    """
    x_ref = refs[0]
    w_refs = refs[1:1 + n_layers]
    a_refs = refs[1 + n_layers:1 + 2 * n_layers]
    o_ref = refs[1 + 2 * n_layers]

    h = x_ref[...]                                        # (bm, K0_pad) compute dtype
    for l in range(n_layers):
        acc = jnp.dot(h, w_refs[l][...],
                      preferred_element_type=jnp.float32)  # (bm, N_l_pad) f32
        scale = a_refs[l][0:1, :]                           # (1, N_l_pad) f32
        bias = a_refs[l][1:2, :]                            # (1, N_l_pad) f32
        y = act_fn(acc * scale + bias)                      # f32 epilogue
        if l + 1 < n_layers:
            h = y.astype(w_refs[l + 1].dtype)               # back to compute dtype
        else:
            h = y
    o_ref[...] = h.astype(o_ref.dtype)


def fused_nlayer(x2d, weights, affines, act_fn, *, compute_dtype=None, bm_cap=256):
    """y = act(...act(act(x @ w0 * s0 + b0) @ w1 * s1 + b1)...) in one kernel.

    x2d: (M, K0). weights[l]: (K_l, N_l) in (in, out) layout. affines[l] is a
    (scale, bias) pair of (N_l,) vectors (scale = weight_norm g/||v||, or ones).
    """
    M, K0 = x2d.shape
    n_layers = len(weights)
    cdt = jnp.dtype(compute_dtype) if compute_dtype is not None else x2d.dtype
    out_dtype = x2d.dtype
    align = _sublane_align(cdt)

    # Lane-dense feature dims: pad every layer width up to a multiple of 128.
    dims = [K0] + [w.shape[1] for w in weights]
    assert all(weights[l].shape[0] == dims[l] for l in range(n_layers))
    dims_pad = [_round_up(d, 128) for d in dims]

    # Row-block selection: dtype-aware sublane alignment, capped size, and at
    # least 2 blocks when there are enough rows (keeps both v7x TCs busy).
    m_aligned = _round_up(M, align)
    bm = min(bm_cap, m_aligned)
    if m_aligned // bm < 2 and m_aligned >= 2 * align:
        bm = _round_up(pl.cdiv(m_aligned, 2), align)
    m_pad = _round_up(m_aligned, bm)
    grid = (m_pad // bm,)

    # Pad + cast inputs. Padded weight rows/cols are zero, padded scale is 1
    # and padded bias is 0, so padded columns never contaminate real outputs.
    x_p = jnp.zeros((m_pad, dims_pad[0]), cdt).at[:M, :K0].set(x2d.astype(cdt))
    ws_p = []
    for l, w in enumerate(weights):
        wp = jnp.zeros((dims_pad[l], dims_pad[l + 1]), cdt)
        ws_p.append(wp.at[:dims[l], :dims[l + 1]].set(w.astype(cdt)))
    afs_p = []
    for l, (s, b) in enumerate(affines):
        ap = jnp.ones((2, dims_pad[l + 1]), jnp.float32)
        ap = ap.at[1, :].set(0.0)
        ap = ap.at[0, :dims[l + 1]].set(s.astype(jnp.float32))
        ap = ap.at[1, :dims[l + 1]].set(b.astype(jnp.float32))
        afs_p.append(ap)

    # Rough VMEM budget (weights double-buffered worst case + x/out blocks +
    # live f32 intermediates). Keeps us honest on v7x's 64 MiB VMEM.
    itemsize = jnp.dtype(cdt).itemsize
    w_bytes = sum(dims_pad[l] * dims_pad[l + 1] for l in range(n_layers)) * itemsize
    io_bytes = 2 * bm * (dims_pad[0] * itemsize + dims_pad[-1] * jnp.dtype(out_dtype).itemsize)
    live_bytes = 2 * bm * max(dims_pad) * 4
    est = 2 * w_bytes + io_bytes + live_bytes + (1 << 20)
    if est > 56 * (1 << 20):
        # TODO(synk): for very large layers, tile K/N with pltpu.emit_pipeline
        # instead of keeping whole weights VMEM-resident.
        raise NotImplementedError("NLayer weights too large for the VMEM-resident fused path")
    vmem_kw = {}
    if est > 24 * (1 << 20):
        vmem_kw["vmem_limit_bytes"] = int(min(est + (8 << 20), 60 * (1 << 20)))

    in_specs = [pl.BlockSpec((bm, dims_pad[0]), lambda i: (i, 0))]
    for l in range(n_layers):  # whole weight resident; constant block index
        in_specs.append(pl.BlockSpec((dims_pad[l], dims_pad[l + 1]), lambda i: (0, 0)))
    for l in range(n_layers):  # (scale, bias) rows, f32
        in_specs.append(pl.BlockSpec((2, dims_pad[l + 1]), lambda i: (0, 0)))
    out_specs = pl.BlockSpec((bm, dims_pad[-1]), lambda i: (i, 0))

    kernel = functools.partial(_fused_mlp_kernel, n_layers=n_layers, act_fn=act_fn)
    out = pl.pallas_call(
        kernel,
        out_shape=jax.ShapeDtypeStruct((m_pad, dims_pad[-1]), out_dtype),
        grid=grid,
        in_specs=in_specs,
        out_specs=out_specs,
        compiler_params=pltpu.CompilerParams(
            dimension_semantics=("parallel",), **vmem_kw),
    )(x_p, *ws_p, *afs_p)
    return out[:M, :dims[-1]]


class NLayerPallas:
    """Mirror of the PyTorch NLayer module: n_layers x (Linear -> activation)."""

    def __init__(self, dim_in, dim_out, n_layers, dim_hidden=None, act="relu",
                 wn=False, *, key=None, dtype=jnp.float32, compute_dtype=None,
                 **kwargs):
        if dim_hidden is None:
            dim_hidden = dim_out
        dims = [dim_in] + [dim_hidden] * (n_layers - 1) + [dim_out]
        self.act_fn = _ACTIVATIONS[act]
        self.wn = wn
        self.compute_dtype = compute_dtype  # e.g. jnp.bfloat16 on v6e/v7x
        if key is None:
            key = jax.random.PRNGKey(0)

        # Weights stored as (in, out) = (K, N) so the kernel output is
        # lane-dense; no transpose on the hot path.
        self.weights, self.biases, self.gains = [], [], []
        for i in range(len(dims) - 1):
            key, kw, kb = jax.random.split(key, 3)
            bound = 1.0 / float(dims[i]) ** 0.5            # PyTorch Linear init
            w = jax.random.uniform(kw, (dims[i], dims[i + 1]), dtype, -bound, bound)
            b = jax.random.uniform(kb, (dims[i + 1],), dtype, -bound, bound)
            self.weights.append(w)
            self.biases.append(b)
            if wn:
                # weight_norm init: g = ||v|| per output unit -> w_eff == v.
                self.gains.append(jnp.linalg.norm(w, axis=0))

    def __call__(self, x):
        lead = x.shape[:-1]
        y = x.reshape(-1, x.shape[-1])
        affines = []
        for l in range(len(self.weights)):
            if self.wn:
                # weight_norm reparam w_eff = v * (g / ||v||): fold the small
                # per-column scale into the kernel epilogue instead of
                # rewriting the whole (K, N) weight in HBM every forward.
                s = self.gains[l] / jnp.linalg.norm(self.weights[l], axis=0)
            else:
                s = jnp.ones((self.weights[l].shape[1],), jnp.float32)
            affines.append((s, self.biases[l]))
        y = fused_nlayer(y, self.weights, affines, self.act_fn,
                         compute_dtype=self.compute_dtype)
        return y.reshape(*lead, y.shape[-1])


def _nlayer_ref(x, weights, biases, act_fn, gains=None):
    lead = x.shape[:-1]
    y = x.reshape(-1, x.shape[-1])
    for l, (w, b) in enumerate(zip(weights, biases)):
        if gains is not None:
            w = w * (gains[l] / jnp.linalg.norm(w, axis=0))
        y = act_fn(y @ w + b)
    return y.reshape(*lead, y.shape[-1])


if __name__ == "__main__":
    key = jax.random.PRNGKey(0)
    batch, seq, dim_in, dim_hidden, dim_out, n_layers = 2, 8, 4, 32, 32, 3
    kx, kp, kp2 = jax.random.split(key, 3)
    x = jax.random.normal(kx, (batch, seq, dim_in), dtype=jnp.float32)

    # 1) plain f32 path (tight tolerance vs pure-JAX reference)
    module = NLayerPallas(dim_in=dim_in, dim_out=dim_out, n_layers=n_layers,
                          dim_hidden=dim_hidden, act="relu", wn=False, key=kp)
    y = jax.block_until_ready(module(x))
    y_ref = _nlayer_ref(x, module.weights, module.biases, module.act_fn)
    assert y.shape == (batch, seq, dim_out) and y.dtype == x.dtype
    assert bool(jnp.allclose(y, y_ref, atol=1e-5, rtol=1e-5))

    # 2) weight_norm path: scale folded into the kernel epilogue
    module_wn = NLayerPallas(dim_in=dim_in, dim_out=dim_out, n_layers=n_layers,
                             dim_hidden=dim_hidden, act="tanh", wn=True, key=kp2)
    y_wn = jax.block_until_ready(module_wn(x))
    y_wn_ref = _nlayer_ref(x, module_wn.weights, module_wn.biases,
                           module_wn.act_fn, gains=module_wn.gains)
    assert bool(jnp.allclose(y_wn, y_wn_ref, atol=1e-5, rtol=1e-5))

    # 3) bf16 compute path (f32 MXU accumulation + f32 epilogue), loose tol
    module_bf = NLayerPallas(dim_in=dim_in, dim_out=dim_out, n_layers=n_layers,
                             dim_hidden=dim_hidden, act="relu", wn=False, key=kp,
                             compute_dtype=jnp.bfloat16)
    y_bf = jax.block_until_ready(module_bf(x))
    assert y_bf.dtype == x.dtype
    assert bool(jnp.allclose(y_bf, y_ref, atol=1e-1, rtol=1e-1))

    print("KERNEL_OK")
</pallas_src>

<mosaic_0001>
module attributes {stable_mosaic.version = 11 : i64} {
  func.func @_fused_mlp_kernel(%arg0: i32, %arg1: memref<8x128xf32, #tpu.memory_space<vmem>>, %arg2: memref<128x128xf32, #tpu.memory_space<vmem>>, %arg3: memref<128x128xf32, #tpu.memory_space<vmem>>, %arg4: memref<128x128xf32, #tpu.memory_space<vmem>>, %arg5: memref<2x128xf32, #tpu.memory_space<vmem>>, %arg6: memref<2x128xf32, #tpu.memory_space<vmem>>, %arg7: memref<2x128xf32, #tpu.memory_space<vmem>>, %arg8: memref<8x128xf32, #tpu.memory_space<vmem>>) attributes {dimension_semantics = [#tpu.dimension_semantics<parallel>], iteration_bounds = array<i64: 2>, scalar_prefetch = 0 : i64, scratch_operands = 0 : i64, tpu.core_type = #tpu.core_type<tc>, window_params = [{transform_indices = @transform_0, window_bounds = array<i64: 8, 128>}, {pipeline_mode = #tpu.pipeline_mode<synchronous>, transform_indices = @transform_1, window_bounds = array<i64: 128, 128>}, {pipeline_mode = #tpu.pipeline_mode<synchronous>, transform_indices = @transform_2, window_bounds = array<i64: 128, 128>}, {pipeline_mode = #tpu.pipeline_mode<synchronous>, transform_indices = @transform_3, window_bounds = array<i64: 128, 128>}, {pipeline_mode = #tpu.pipeline_mode<synchronous>, transform_indices = @transform_4, window_bounds = array<i64: 2, 128>}, {pipeline_mode = #tpu.pipeline_mode<synchronous>, transform_indices = @transform_5, window_bounds = array<i64: 2, 128>}, {pipeline_mode = #tpu.pipeline_mode<synchronous>, transform_indices = @transform_6, window_bounds = array<i64: 2, 128>}, {transform_indices = @transform_7, window_bounds = array<i64: 8, 128>}]} {
    %c0 = arith.constant 0 : index
    %c0_0 = arith.constant 0 : index
    %0 = vector.load %arg1[%c0, %c0_0] : memref<8x128xf32, #tpu.memory_space<vmem>>, vector<8x128xf32>
    %c0_1 = arith.constant 0 : index
    %c0_2 = arith.constant 0 : index
    %1 = vector.load %arg2[%c0_1, %c0_2] : memref<128x128xf32, #tpu.memory_space<vmem>>, vector<128x128xf32>
    %cst = arith.constant dense<0.000000e+00> : vector<8x128xf32>
    %2 = tpu.matmul %0, %1, %cst {dimension_numbers = #tpu.dot_dimension_numbers<[1], [0], [0], [1], [0, 0, 1, 1], [], []>} : vector<8x128xf32>, vector<128x128xf32>, vector<8x128xf32> -> vector<8x128xf32>
    %c0_3 = arith.constant 0 : index
    %c0_4 = arith.constant 0 : index
    %3 = vector.load %arg5[%c0_3, %c0_4] : memref<2x128xf32, #tpu.memory_space<vmem>>, vector<1x128xf32>
    %c1 = arith.constant 1 : index
    %c0_5 = arith.constant 0 : index
    %4 = vector.load %arg5[%c1, %c0_5] : memref<2x128xf32, #tpu.memory_space<vmem>>, vector<1x128xf32>
    %5 = vector.broadcast %3 : vector<1x128xf32> to vector<8x128xf32>
    %6 = arith.mulf %2, %5 : vector<8x128xf32>
    %7 = vector.broadcast %4 : vector<1x128xf32> to vector<8x128xf32>
    %8 = arith.addf %6, %7 : vector<8x128xf32>
    %cst_6 = arith.constant 0.000000e+00 : f32
    %9 = vector.broadcast %cst_6 : f32 to vector<8x128xf32>
    %10 = arith.maximumf %8, %9 : vector<8x128xf32>
    %c0_7 = arith.constant 0 : index
    %c0_8 = arith.constant 0 : index
    %11 = vector.load %arg3[%c0_7, %c0_8] : memref<128x128xf32, #tpu.memory_space<vmem>>, vector<128x128xf32>
    %cst_9 = arith.constant dense<0.000000e+00> : vector<8x128xf32>
    %12 = tpu.matmul %10, %11, %cst_9 {dimension_numbers = #tpu.dot_dimension_numbers<[1], [0], [0], [1], [0, 0, 1, 1], [], []>} : vector<8x128xf32>, vector<128x128xf32>, vector<8x128xf32> -> vector<8x128xf32>
    %c0_10 = arith.constant 0 : index
    %c0_11 = arith.constant 0 : index
    %13 = vector.load %arg6[%c0_10, %c0_11] : memref<2x128xf32, #tpu.memory_space<vmem>>, vector<1x128xf32>
    %c1_12 = arith.constant 1 : index
    %c0_13 = arith.constant 0 : index
    %14 = vector.load %arg6[%c1_12, %c0_13] : memref<2x128xf32, #tpu.memory_space<vmem>>, vector<1x128xf32>
    %15 = vector.broadcast %13 : vector<1x128xf32> to vector<8x128xf32>
    %16 = arith.mulf %12, %15 : vector<8x128xf32>
    %17 = vector.broadcast %14 : vector<1x128xf32> to vector<8x128xf32>
    %18 = arith.addf %16, %17 : vector<8x128xf32>
    %cst_14 = arith.constant 0.000000e+00 : f32
    %19 = vector.broadcast %cst_14 : f32 to vector<8x128xf32>
    %20 = arith.maximumf %18, %19 : vector<8x128xf32>
    %c0_15 = arith.constant 0 : index
    %c0_16 = arith.constant 0 : index
    %21 = vector.load %arg4[%c0_15, %c0_16] : memref<128x128xf32, #tpu.memory_space<vmem>>, vector<128x128xf32>
    %cst_17 = arith.constant dense<0.000000e+00> : vector<8x128xf32>
    %22 = tpu.matmul %20, %21, %cst_17 {dimension_numbers = #tpu.dot_dimension_numbers<[1], [0], [0], [1], [0, 0, 1, 1], [], []>} : vector<8x128xf32>, vector<128x128xf32>, vector<8x128xf32> -> vector<8x128xf32>
    %c0_18 = arith.constant 0 : index
    %c0_19 = arith.constant 0 : index
    %23 = vector.load %arg7[%c0_18, %c0_19] : memref<2x128xf32, #tpu.memory_space<vmem>>, vector<1x128xf32>
    %c1_20 = arith.constant 1 : index
    %c0_21 = arith.constant 0 : index
    %24 = vector.load %arg7[%c1_20, %c0_21] : memref<2x128xf32, #tpu.memory_space<vmem>>, vector<1x128xf32>
    %25 = vector.broadcast %23 : vector<1x128xf32> to vector<8x128xf32>
    %26 = arith.mulf %22, %25 : vector<8x128xf32>
    %27 = vector.broadcast %24 : vector<1x128xf32> to vector<8x128xf32>
    %28 = arith.addf %26, %27 : vector<8x128xf32>
    %cst_22 = arith.constant 0.000000e+00 : f32
    %29 = vector.broadcast %cst_22 : f32 to vector<8x128xf32>
    %30 = arith.maximumf %28, %29 : vector<8x128xf32>
    %c0_23 = arith.constant 0 : index
    %c0_24 = arith.constant 0 : index
    %31 = vector.load %arg8[%c0_23, %c0_24] : memref<8x128xf32, #tpu.memory_space<vmem>>, vector<8x128xf32>
    tpu.vector_store %arg8[%c0_23, %c0_24], %30 {strides = array<i32>} : memref<8x128xf32, #tpu.memory_space<vmem>>, vector<8x128xf32>,
    return
  }
  func.func @transform_0(%arg0: i32) -> (i32, i32) {
    %c0_i32 = arith.constant 0 : i32
    %c0_i32_0 = arith.constant 0 : i32
    return %arg0, %c0_i32 : i32, i32
  }
  func.func @transform_1(%arg0: i32) -> (i32, i32) {
    %c0_i32 = arith.constant 0 : i32
    %c0_i32_0 = arith.constant 0 : i32
    %c0_i32_1 = arith.constant 0 : i32
    return %c0_i32, %c0_i32_0 : i32, i32
  }
  func.func @transform_2(%arg0: i32) -> (i32, i32) {
    %c0_i32 = arith.constant 0 : i32
    %c0_i32_0 = arith.constant 0 : i32
    %c0_i32_1 = arith.constant 0 : i32
    return %c0_i32, %c0_i32_0 : i32, i32
  }
  func.func @transform_3(%arg0: i32) -> (i32, i32) {
    %c0_i32 = arith.constant 0 : i32
    %c0_i32_0 = arith.constant 0 : i32
    %c0_i32_1 = arith.constant 0 : i32
    return %c0_i32, %c0_i32_0 : i32, i32
  }
  func.func @transform_4(%arg0: i32) -> (i32, i32) {
    %c0_i32 = arith.constant 0 : i32
    %c0_i32_0 = arith.constant 0 : i32
    %c0_i32_1 = arith.constant 0 : i32
    return %c0_i32, %c0_i32_0 : i32, i32
  }
  func.func @transform_5(%arg0: i32) -> (i32, i32) {
    %c0_i32 = arith.constant 0 : i32
    %c0_i32_0 = arith.constant 0 : i32
    %c0_i32_1 = arith.constant 0 : i32
    return %c0_i32, %c0_i32_0 : i32, i32
  }
  func.func @transform_6(%arg0: i32) -> (i32, i32) {
    %c0_i32 = arith.constant 0 : i32
    %c0_i32_0 = arith.constant 0 : i32
    %c0_i32_1 = arith.constant 0 : i32
    return %c0_i32, %c0_i32_0 : i32, i32
  }
  func.func @transform_7(%arg0: i32) -> (i32, i32) {
    %c0_i32 = arith.constant 0 : i32
    %c0_i32_0 = arith.constant 0 : i32
    return %arg0, %c0_i32 : i32, i32
  }
}

</mosaic_0001>

<bundles_post_ra>
// kernel: tpu_custom_call.1
= control target key start
LH: loop header
LB: loop body
LE: loop exit
PB: predicated region body
PF: predicated region fallthrough
CT: control target
= control target key end

     0   :  { %12 = vsyncpa [#allocation3], 0  ;;  %s1642_s0 = inlined_call_operand.hbm [shape: f32[16,128], index: 0, kind: input, shape index: {}]   ;;  %s1643_s1 = inlined_call_operand.hbm [shape: f32[128,128], index: 1, kind: input, shape index: {}]   ;;  %s1644_s2 = inlined_call_operand.hbm [shape: f32[128,128], index: 2, kind: input, shape index: {}]   ;;  %s1645_s3 = inlined_call_operand.hbm [shape: f32[128,128], index: 3, kind: input, shape index: {}]   ;;  %s1646_s4 = inlined_call_operand.vmem [shape: f32[2,128], index: 4, kind: input, shape index: {}]   ;;  %s1647_s5 = inlined_call_operand.vmem [shape: f32[2,128], index: 5, kind: input, shape index: {}]   ;;  %s1648_s6 = inlined_call_operand.vmem [shape: f32[2,128], index: 6, kind: input, shape index: {}]   ;;  %s1649_s7 = inlined_call_operand.hbm [shape: f32[16,128], index: 7, kind: output, shape index: {}]  }
   0x1   :  { %14 = vsyncpa [#allocation3 + $0x1], 0 }
   0x2   :  { %15 = vsyncpa [#allocation6], 0 }
   0x3   :  { %16 = vsyncpa [#allocation9], 0 }
   0x4   :  { %17 = vsyncpa [#allocation4], 0 }
   0x5   :  { %19 = vsyncpa [#allocation4 + $0x1], 0  ;;  %s1324_s24 = smov 0   ;;  %s1326_s25 = smov 0  }
   0x6   :  { %s1328_s26 = smov 0   ;;  %s1330_s27 = smov 0  }
   0x7 LB: > { %s1345_s28 = sadd.s32 4294967295, %s1272_s27   ;;  %s750_s29 = sadd.s32 4294967294, %s1272_s27   ;;  %s1272_s27 = sphi %s1330_s27, %s1675_s27   ;;  %s1268_s26 = sphi %s1328_s26, %s1674_s26   ;;  %s1264_s25 = sphi %s1326_s25, %s1673_s25   ;;  %s1260_s24 = sphi %s1324_s24, %s1672_s24  }
   0x8   : > { %p45_p0 = scmp.ne.s32.totalorder %s1264_s25, %s1260_s24  ;;  %p1650_p1 = scmp.eq.s32.totalorder %s1345_s28, 0 }
   0x9   : > { %p201_p3 = scmp.eq.s32.totalorder %s750_s29, 1  ;;  %p751_p5 = scmp.ge.s32.totalorder %s1272_s27, 1 }
   0xa   : > { %p1354_p4 = por %p1650_p1, %p45_p0  ;;  %p208_p7 = scmp.lt.s32.totalorder %s1272_s27, 3 }
   0xb   : > { %p1359_p6 = por %p201_p3, %p45_p0  ;;  %s1274_s10 = smov [#allocation5]  }
   0xc   : > { %s1654_s30 = scalar_select %p1354_p4, 1, 0 }
   0xd   : > { %s1655_s8 = scalar_select %p1359_p6, 1, 0 }
   0xe   : > { %p1364_p8 = pnand %p751_p5, %p208_p7  ;;  %s220_s11 = sshll.u32 %s1274_s10, 4  ;;  %s1368_s11 = int_to_ptr.vmem [resolvable:$true] %s220_s11 }
   0xf   : > { %1656 = sst [smem:[#allocation15_spill]] %s1655_s8  ;;  %s1275_s13 = smov [#allocation7]  }
  0x10   : > { %s1657_s9 = scalar_select %p1364_p8, 1, 0 }
  0x11   : > { %p1018_p9 = pneg %p1364_p8  ;;  %s233_s14 = sshll.u32 %s1275_s13, 4  ;;  %s1379_s14 = int_to_ptr.vmem [resolvable:$true] %s233_s14 }
  0x12   : > { %s1276_s15 = smov [#allocation8]   ;;  %s1084_s19 = scalar_lea.hbm %s1643_s1, 2048 }
  0x13   : > { %p1375_p11 = pnand %p1018_p9, %p1650_p1  ;;  %s1381_s16 = sshll.u32 %s1276_s15, 4  ;;  %s247_s16 = int_to_ptr.vmem [resolvable:$true] %s1381_s16 }
  0x14   : > { %p1085_p12 = scmp.ne.s32.totalorder %s1643_s1, %s1084_s19  ;;  %p1091_p5 = scmp.lt.u32.totalorder %s1084_s19, %s1643_s1 }
  0x15   : > { %p1391_p13 = pneg %p1375_p11 }
  0x17   : > { %p1087_p0 = pnand %p1391_p13, %p1085_p12 }
  0x19   : > { %p1088_p3 = pneg %p1087_p0 }
  0x1b   : > { %p1093_p7 = pnand %p1091_p5, %p1088_p3 }
  0x1d   : > { %1096 = shalt.err (!%p1093_p7)
}
  0x1e   : > { %s1097_s10 = scalar_lea.vmem %s1368_s11, 2048  ;;  %p1105_p2 = scmp.lt.s32.totalorder %s1368_s11, %s1368_s11 }
  0x1f   : > { %p1098_p9 = scmp.ne.s32.totalorder %s1368_s11, %s1097_s10  ;;  %p1106_p6 = scmp.lt.s32.totalorder %s1097_s10, %s1097_s10 }
  0x21   : > { %p1100_p10 = pnand %p1098_p9, %p1391_p13  ;;  %p1107_p12 = por %p1106_p6, %p1105_p2 }
  0x23   : > { %p1101_p1 = pneg %p1100_p10 }
  0x25   : > { %p1108_p0 = pnand %p1107_p12, %p1101_p1 }
  0x27   : > { %1111 = shalt.err (!%p1108_p0)
}
  0x28   : > { %s1277_s13 = smov 128   ;;  %s1278_s15 = smov 8  }
  0x29   : > { %1021 = dma.hbm_to_vmem [thread:$0]  (!%p1375_p11), %s1643_s1, 2048, %s1368_s11, [#allocation6], %s1277_s13, %s1277_s13, %s1278_s15  }
  0x2a   : > { %s1112_s21 = scalar_lea.hbm %s1644_s2, 2048 }
  0x2b   : > { %p1113_p1 = scmp.ne.s32.totalorder %s1644_s2, %s1112_s21  ;;  %p1119_p10 = scmp.lt.u32.totalorder %s1112_s21, %s1644_s2 }
  0x2d   : > { %p1115_p2 = pnand %p1113_p1, %p1391_p13 }
  0x2f   : > { %p1116_p6 = pneg %p1115_p2 }
  0x31   : > { %p1121_p3 = pnand %p1119_p10, %p1116_p6 }
  0x33   : > { %1124 = shalt.err (!%p1121_p3)
}
  0x34   : > { %s1125_s11 = scalar_lea.vmem %s1379_s14, 2048  ;;  %p1133_p12 = scmp.lt.s32.totalorder %s1379_s14, %s1379_s14 }
  0x35   : > { %p1126_p5 = scmp.ne.s32.totalorder %s1379_s14, %s1125_s11  ;;  %p1134_p0 = scmp.lt.s32.totalorder %s1125_s11, %s1125_s11 }
  0x37   : > { %p1128_p7 = pnand %p1126_p5, %p1391_p13  ;;  %p1135_p1 = por %p1134_p0, %p1133_p12 }
  0x39   : > { %p1129_p9 = pneg %p1128_p7 }
  0x3b   : > { %p1136_p2 = pnand %p1135_p1, %p1129_p9 }
  0x3d   : > { %1139 = shalt.err (!%p1136_p2)
}
  0x3e   : > { %1024 = dma.hbm_to_vmem [thread:$0]  (!%p1375_p11), %s1644_s2, 2048, %s1379_s14, [#allocation6], %s1277_s13, %s1277_s13, %s1278_s15  }
  0x3f   : > { %s1140_s20 = scalar_lea.hbm %s1645_s3, 2048 }
  0x40   : > { %p1141_p6 = scmp.ne.s32.totalorder %s1645_s3, %s1140_s20  ;;  %p1147_p5 = scmp.lt.u32.totalorder %s1140_s20, %s1645_s3 }
  0x42   : > { %p1143_p10 = pnand %p1141_p6, %p1391_p13 }
  0x44   : > { %p1144_p3 = pneg %p1143_p10 }
  0x46   : > { %p1149_p7 = pnand %p1147_p5, %p1144_p3 }
  0x48   : > { %1152 = shalt.err (!%p1149_p7)
}
  0x49   : > { %s1153_s11 = scalar_lea.vmem %s247_s16, 2048  ;;  %p1161_p1 = scmp.lt.s32.totalorder %s247_s16, %s247_s16 }
  0x4a   : > { %p1154_p9 = scmp.ne.s32.totalorder %s247_s16, %s1153_s11  ;;  %p1162_p2 = scmp.lt.s32.totalorder %s1153_s11, %s1153_s11 }
  0x4c   : > { %p1156_p12 = pnand %p1154_p9, %p1391_p13  ;;  %p1163_p4 = por %p1162_p2, %p1161_p1 }
  0x4e   : > { %p1157_p0 = pneg %p1156_p12 }
  0x50   : > { %p1164_p8 = pnand %p1163_p4, %p1157_p0 }
  0x52   : > { %1167 = shalt.err (!%p1164_p8)
}
  0x53   : > { %1027 = dma.hbm_to_vmem [thread:$0]  (!%p1375_p11), %s1645_s3, 2048, %s247_s16, [#allocation9], %s1277_s13, %s1277_s13, %s1278_s15  }
  0x54   : > { %s1464_s22 = sadd.s32 1, %s1272_s27   ;;  %s32_s17 = sadd.s32 1, %s1268_s26 }
  0x55   : > { %s29_s12 = ssub.s32 %s1272_s27, %s1464_s22  ;;  %p39_p8 = scmp.ne.s32.totalorder %s1268_s26, %s1264_s25 }
  0x56   : > { %p30_p4 = scmp.eq.s32.totalorder %s29_s12, 0  ;;  %p40_p13 = scmp.eq.s32.totalorder %s1272_s27, 0 }
  0x57   : > { %p1039_p6 = scmp.lt.s32.totalorder %s1272_s27, 2  ;;  %p1660_p3 = scmp.eq.s32.totalorder %s1345_s28, 1 }
  0x58   : > { %s1474_s18 = scalar_select %p30_p4, %s1268_s26, %s32_s17  }
  0x59   : > { %p41_p10 = por %p40_p13, %p39_p8  ;;  %p1478_p5 = por %p1660_p3, %p39_p8 }
  0x5a   : > { %s269_s20 = sand.u32 1, %s1268_s26   ;;  %s757_s21 = sshll.u32 %s1272_s27, 7 }
  0x5b   : > { %s756_s16 = sshll.u32 %s269_s20, 3  ;;  %s1487_s23 = scalar_lea.hbm %s1642_s0, %s757_s21 }
  0x5c   : > { %s273_s29 = scalar_lea.vmem [#allocation2], %s756_s16  ;;  %p1489_p11 = pnand %p1039_p6, %p41_p10 }
  0x5d   : > { %s280_s10 = sshll.u32 %s273_s29, 4  ;;  %s270_s14 = scalar_lea.sflag [#allocation3], %s269_s20  ;;  %s1493_s10 = int_to_ptr.vmem [resolvable:$true] %s280_s10 }
  0x5e   : > { %s1168_s8 = scalar_lea.hbm %s1487_s23, 128  ;;  %p1170_p9 = pneg %p1489_p11 }
  0x5f   : > { %p1169_p7 = scmp.ne.s32.totalorder %s1487_s23, %s1168_s8  ;;  %s1173_s21 = scalar_lea.hbm %s1642_s0, 256 }
  0x60   : > { %p1174_p1 = scmp.lt.u32.totalorder %s1487_s23, %s1642_s0  ;;  %p1175_p2 = scmp.lt.u32.totalorder %s1173_s21, %s1168_s8 }
  0x61   : > { %p1171_p12 = pnand %p1170_p9, %p1169_p7  ;;  %p1177_p8 = scmp.lt.u32.totalorder %s1168_s8, %s1487_s23 }
  0x62   : > { %p1176_p4 = por %p1175_p2, %p1174_p1 }
  0x63   : > { %p1172_p0 = pneg %p1171_p12 }
  0x64   : > { %p1178_p13 = por %p1177_p8, %p1176_p4 }
  0x66   : > { %p1179_p6 = pnand %p1178_p13, %p1172_p0 }
  0x68   : > { %1182 = shalt.err (!%p1179_p6)
}
  0x69   : > { %s1183_s20 = scalar_lea.vmem %s1493_s10, 128  ;;  %s1279_s15 = smov [#allocation2]  }
  0x6a   : > { %p1184_p10 = scmp.ne.s32.totalorder %s1493_s10, %s1183_s20  ;;  %s1188_s29 = sshll.u32 %s1279_s15, 4  ;;  %s1189_s29 = int_to_ptr.vmem [resolvable:$false] %s1188_s29 }
  0x6b   : > { %s1190_s12 = scalar_lea.vmem %s1189_s29, 256  ;;  %p1191_p12 = scmp.lt.s32.totalorder %s1493_s10, %s1189_s29 }
  0x6c   : > { %p1186_p3 = pnand %p1184_p10, %p1170_p9  ;;  %p1192_p1 = scmp.lt.s32.totalorder %s1190_s12, %s1183_s20 }
  0x6e   : > { %p1187_p7 = pneg %p1186_p3  ;;  %p1193_p2 = por %p1192_p1, %p1191_p12 }
  0x70   : > { %p1194_p4 = pnand %p1193_p2, %p1187_p7 }
  0x72   : > { %1197 = shalt.err (!%p1194_p4)
}
  0x73   : > { %1031 = dma.hbm_to_vmem [thread:$0]  (!%p1489_p11), %s1487_s23, 128, %s1493_s10, %s270_s14  }
  0x74   : > { %p1663_p0 = scmp.ne.s32.totalorder %s1657_s9, 0 }
  0x75   : > { %s1523_s8 = sand.u32 (!%p1663_p0), 1, %s1264_s25   ;;  %p1664_p9 = scmp.ne.s32.totalorder (!%p1663_p0), %s1654_s30, 0 }
  0x76   : > { %289 = sbr.rel (%p1663_p0) target bundleno = 836 (0x344), region = 48  ;;  %s759_s17 = sshll.u32 (!%p1663_p0), %s1523_s8, 3 }
  0x77   : > { %s292_s21 = scalar_lea.sflag (!%p1663_p0), [#allocation3], %s1523_s8  ;;  %s1529_s16 = scalar_lea.vmem (!%p1663_p0), [#allocation2], %s759_s17 }
  0x7d   : > { %1243 = dma.done.wait (%p1664_p9), %s292_s21, 128  }
  0x7e   : > { %1245 = vsyncadd (%p1664_p9), %s292_s21, 4294967168  ;;  %p1665_p11 = scmp.eq.s32.totalorder %s1345_s28, 0 }
  0x80   : > { %1247 = dma.done.wait (%p1665_p11), [#allocation6], 4096   ;;  %p1666_p8 = pmov %p1665_p11 }
  0x82   : > { %1249 = vsyncadd (%p1666_p8), [#allocation6], 4294963200  ;;  %p1667_p13 = pmov %p1666_p8 }
  0x83   : > { %p1668_p6 = pmov %p1666_p8 }
  0x84   : > { %1251 = dma.done.wait (%p1667_p13), [#allocation9], 2048  }
  0x85   : > { %1253 = vsyncadd (%p1668_p6), [#allocation9], 4294965248  ;;  %v1280_v0 = vmov 0.0|0.0   ;;  %vm1281_vm0 = vmmov 0   ;;  %v1282_v1 = vmov 0.0   ;;  %v339_v2 = vld [vmem:[#allocation5] sm:$0xff] }
  0x86   : > { %930 = vmatprep.subr.bf16.mxu0 %v1280_v0  ;;  %857 = vmatprep.mubr.msk.f32.mxu0 %vm1281_vm0, %v1282_v1  ;;  %v340_v3 = vld [vmem:[#allocation5 + $0x8] sm:$0xff]  ;;  %v341_v4 = vld [vmem:[#allocation5 + $0x10] sm:$0xff]  ;;  %v342_v6 = vld [vmem:[#allocation5 + $0x18] sm:$0xff]  ;;  %s337_s30 = scalar_lea.vmem [#allocation10], %s759_s17  ;;  %s638_s14 = scalar_lea.sflag [#allocation4], %s1523_s8 }
  0x87   : > { %954 = vmatprep.subr.bf16.mxu1 %v1280_v0  ;;  %892 = vmatprep.mubr.msk.f32.mxu1 %vm1281_vm0, %v1282_v1  ;;  %v931_v5 = vpack.c.bf16 %v340_v3, %v339_v2  ;;  %v934_v7 = vpack.c.bf16 %v342_v6, %v341_v4  ;;  %v343_v8 = vld [vmem:[#allocation5 + $0x20] sm:$0xff]  ;;  %v344_v9 = vld [vmem:[#allocation5 + $0x28] sm:$0xff]  ;;  %v440_v12 = vld [vmem:[#allocation7 + $0x10] sm:$0xff]  ;;  %s651_s9 = sshll.u32 %s337_s30, 4  ;;  %s1600_s9 = int_to_ptr.vmem [resolvable:$true] %s651_s9 }
  0x88   : > { %v438_v10 = vld [vmem:[#allocation7] sm:$0xff]  ;;  %v439_v11 = vld [vmem:[#allocation7 + $0x8] sm:$0xff]  ;;  %v441_v13 = vld [vmem:[#allocation7 + $0x18] sm:$0xff]  ;;  %v937_v14 = vpack.c.bf16 %v344_v9, %v343_v8  ;;  %s1198_s13 = scalar_lea.vmem %s1600_s9, 128 }
  0x89   : > { %932 = vmatpush3.bf16.msra.mxu0 %v931_v5  ;;  %v955_v15 = vpack.c.bf16 %v439_v11, %v438_v10  ;;  %v345_v16 = vld [vmem:[#allocation5 + $0x30] sm:$0xff]  ;;  %v346_v17 = vld [vmem:[#allocation5 + $0x38] sm:$0xff]  ;;  %v958_v18 = vpack.c.bf16 %v441_v13, %v440_v12  ;;  %v442_v19 = vld [vmem:[#allocation7 + $0x20] sm:$0xff]  ;;  %p1199_p10 = scmp.ne.s32.totalorder %s1600_s9, %s1198_s13 }
  0x8a   : > { %933 = vmatprep.subr.bf16.mxu0 %v1280_v0  ;;  %v443_v20 = vld [vmem:[#allocation7 + $0x28] sm:$0xff]  ;;  %v940_v21 = vpack.c.bf16 %v346_v17, %v345_v16  ;;  %v347_v22 = vld [vmem:[#allocation5 + $0x40] sm:$0xff]  ;;  %v444_v25 = vld [vmem:[#allocation7 + $0x30] sm:$0xff] }
  0x8b   : > { %956 = vmatpush3.bf16.msra.mxu1 %v955_v15  ;;  %v348_v23 = vld [vmem:[#allocation5 + $0x48] sm:$0xff]  ;;  %v961_v24 = vpack.c.bf16 %v443_v20, %v442_v19  ;;  %v445_v26 = vld [vmem:[#allocation7 + $0x38] sm:$0xff]  ;;  %v349_v28 = vld [vmem:[#allocation5 + $0x50] sm:$0xff]  ;;  %p1200_p3 = pnand %p1199_p10, %p1478_p5 }
  0x8c   : > { %957 = vmatprep.subr.bf16.mxu1 %v1280_v0  ;;  %v943_v27 = vpack.c.bf16 %v348_v23, %v347_v22  ;;  %v350_v29 = vld [vmem:[#allocation5 + $0x58] sm:$0xff]  ;;  %v964_v30 = vpack.c.bf16 %v445_v26, %v444_v25  ;;  %v446_v31 = vld [vmem:[#allocation7 + $0x40] sm:$0xff]  ;;  %v447_v32 = vld [vmem:[#allocation7 + $0x48] sm:$0xff] }
  0x8d   : > { %935 = vmatpush3.bf16.msra.mxu0 %v934_v7  ;;  %v946_v33 = vpack.c.bf16 %v350_v29, %v349_v28  ;;  %v351_v34 = vld [vmem:[#allocation5 + $0x60] sm:$0xff]  ;;  %v352_v35 = vld [vmem:[#allocation5 + $0x68] sm:$0xff]  ;;  %v967_v36 = vpack.c.bf16 %v447_v32, %v446_v31  ;;  %v448_v37 = vld [vmem:[#allocation7 + $0x50] sm:$0xff]  ;;  %p1201_p7 = pneg %p1200_p3 }
  0x8e   : > { %936 = vmatprep.subr.bf16.mxu0 %v1280_v0  ;;  %v449_v38 = vld [vmem:[#allocation7 + $0x58] sm:$0xff]  ;;  %v949_v39 = vpack.c.bf16 %v352_v35, %v351_v34  ;;  %v353_v40 = vld [vmem:[#allocation5 + $0x70] sm:$0xff]  ;;  %v450_v45 = vld [vmem:[#allocation7 + $0x60] sm:$0xff] }
  0x8f   : > { %959 = vmatpush3.bf16.msra.mxu1 %v958_v18  ;;  %v354_v41 = vld [vmem:[#allocation5 + $0x78] sm:$0xff]  ;;  %v970_v42 = vpack.c.bf16 %v449_v38, %v448_v37  ;;  %v451_v46 = vld [vmem:[#allocation7 + $0x68] sm:$0xff]  ;;  %v452_v48 = vld [vmem:[#allocation7 + $0x70] sm:$0xff] }
  0x90   : > { %960 = vmatprep.subr.bf16.mxu1 %v1280_v0  ;;  %v952_v43 = vpack.c.bf16 %v354_v41, %v353_v40  ;;  %v338_v44 = vld [vmem:[%s1529_s16] sm:$0xff]  ;;  %v973_v47 = vpack.c.bf16 %v451_v46, %v450_v45  ;;  %v537_v51 = vld [vmem:[#allocation8] sm:$0xff]  ;;  %v538_v52 = vld [vmem:[#allocation8 + $0x8] sm:$0xff]  ;;  %s771_s16 = sshll.u32 %s1345_s28, 7  ;;  %s1283_s28 = smov [#allocation10]  }
  0x91   : > { %938 = vmatpush3.bf16.msra.mxu0 %v937_v14  ;;  %v453_v49 = vld [vmem:[#allocation7 + $0x78] sm:$0xff]  ;;  %v539_v53 = vld [vmem:[#allocation8 + $0x10] sm:$0xff]  ;;  %v979_v54 = vpack.c.bf16 %v538_v52, %v537_v51  ;;  %v541_v57 = vld [vmem:[#allocation8 + $0x20] sm:$0xff]  ;;  %s1598_s11 = scalar_lea.hbm %s1649_s7, %s771_s16  ;;  %s1202_s17 = sshll.u32 %s1283_s28, 4  ;;  %s1203_s17 = int_to_ptr.vmem [resolvable:$false] %s1202_s17 }
  0x92   : > { %939 = vmatprep.subr.bf16.mxu0 %v1280_v0  ;;  %v976_v50 = vpack.c.bf16 %v453_v49, %v452_v48  ;;  %v540_v55 = vld [vmem:[#allocation8 + $0x18] sm:$0xff]  ;;  %v542_v58 = vld [vmem:[#allocation8 + $0x28] sm:$0xff]  ;;  %v543_v60 = vld [vmem:[#allocation8 + $0x30] sm:$0xff]  ;;  %s1204_s20 = scalar_lea.vmem %s1203_s17, 256  ;;  %p1205_p12 = scmp.lt.s32.totalorder %s1600_s9, %s1203_s17 }
  0x93   : > { %962 = vmatpush3.bf16.msra.mxu1 %v961_v24  ;;  %v982_v56 = vpack.c.bf16 %v540_v55, %v539_v53  ;;  %v985_v59 = vpack.c.bf16 %v542_v58, %v541_v57  ;;  %v544_v61 = vld [vmem:[#allocation8 + $0x38] sm:$0xff]  ;;  %v545_v63 = vld [vmem:[#allocation8 + $0x40] sm:$0xff]  ;;  %v547_v3 = vld [vmem:[#allocation8 + $0x50] sm:$0xff]  ;;  %p1206_p1 = scmp.lt.s32.totalorder %s1204_s20, %s1198_s13 }
  0x94   : > { %963 = vmatprep.subr.bf16.mxu1 %v1280_v0  ;;  %v988_v62 = vpack.c.bf16 %v544_v61, %v543_v60  ;;  %v548_v4 = vld [vmem:[#allocation8 + $0x58] sm:$0xff]  ;;  %v764_v6 = vld [vmem:[%s1646_s4] ss:$0 sm:$0xff]  ;;  %v765_v8 = vld [vmem:[%s1646_s4 + $0x1] ss:$0 sm:$0xff] }
  0x95   : > { %941 = vmatpush3.bf16.msra.mxu0 %v940_v21  ;;  %v994_v5 = vpack.c.bf16 %v548_v4, %v547_v3  ;;  %v549_v13 = vld [vmem:[#allocation8 + $0x60] sm:$0xff]  ;;  %v550_v14 = vld [vmem:[#allocation8 + $0x68] sm:$0xff]  ;;  %v551_v16 = vld [vmem:[#allocation8 + $0x70] sm:$0xff]  ;;  %p1207_p2 = por %p1206_p1, %p1205_p12 }
  0x96   : > { %942 = vmatprep.subr.bf16.mxu0 %v1280_v0  ;;  %v997_v15 = vpack.c.bf16 %v550_v14, %v549_v13  ;;  %v552_v17 = vld [vmem:[#allocation8 + $0x78] sm:$0xff]  ;;  %v766_v19 = vld [vmem:[%s1647_s5] ss:$0 sm:$0xff]  ;;  %v767_v21 = vld [vmem:[%s1647_s5 + $0x1] ss:$0 sm:$0xff] }
  0x97   : > { %965 = vmatpush3.bf16.msra.mxu1 %v964_v30  ;;  %v1000_v18 = vpack.c.bf16 %v552_v17, %v551_v16  ;;  %v768_v25 = vld [vmem:[%s1648_s6] ss:$0 sm:$0xff]  ;;  %p1208_p4 = pnand %p1207_p2, %p1201_p7 }
  0x98   : > { %966 = vmatprep.subr.bf16.mxu1 %v1280_v0 }
  0x99   : > { %944 = vmatpush3.bf16.msra.mxu0 %v943_v27  ;;  %v769_v27 = vld [vmem:[%s1648_s6 + $0x1] ss:$0 sm:$0xff] }
  0x9a   : > { %945 = vmatprep.subr.bf16.mxu0 %v1280_v0 }
  0x9b   : > { %968 = vmatpush3.bf16.msra.mxu1 %v967_v36 }
  0x9c   : > { %969 = vmatprep.subr.bf16.mxu1 %v1280_v0 }
  0x9d   : > { %947 = vmatpush3.bf16.msra.mxu0 %v946_v33 }
  0x9e   : > { %948 = vmatprep.subr.bf16.mxu0 %v1280_v0 }
  0x9f   : > { %971 = vmatpush3.bf16.msra.mxu1 %v970_v42 }
  0xa0   : > { %972 = vmatprep.subr.bf16.mxu1 %v1280_v0 }
  0xa1   : > { %950 = vmatpush3.bf16.msra.mxu0 %v949_v39 }
  0xa2   : > { %951 = vmatprep.subr.bf16.mxu0 %v1280_v0 }
  0xa3   : > { %974 = vmatpush3.bf16.msra.mxu1 %v973_v47 }
  0xa4   : > { %975 = vmatprep.subr.bf16.mxu1 %v1280_v0 }
  0xa5   : > { %953 = vmatpush3.bf16.msra.mxu0 %v952_v43 }
  0xa6   : > { %978 = vmatprep.subr.bf16.mxu0 %v1280_v0 }
  0xa7   : > { %977 = vmatpush3.bf16.msra.mxu1 %v976_v50 }
  0xa8   : > { %858 = vmatmul.mubr.f32.vlgmr.msra.gmra.mrb[0].mxu0 %v338_v44 }
  0xa9   : > { %927 = vmatprep.mubr.msk.f32.mxu0 %vm1281_vm0, %v1282_v1  ;;  %980 = vmatpush3.bf16.msra.mxu0 %v979_v54  ;;  %v546_v1 = vld [vmem:[#allocation8 + $0x48] sm:$0xff] }
  0xaa   : > { %981 = vmatprep.subr.bf16.mxu0 %v1280_v0  ;;  %v991_v2 = vpack.c.bf16 %v546_v1, %v545_v63 }
  0xad   : > { %983 = vmatpush3.bf16.msra.mxu0 %v982_v56 }
  0xae   : > { %984 = vmatprep.subr.bf16.mxu0 %v1280_v0 }
  0xb1   : > { %986 = vmatpush3.bf16.msra.mxu0 %v985_v59 }
  0xb2   : > { %987 = vmatprep.subr.bf16.mxu0 %v1280_v0 }
  0xb5   : > { %989 = vmatpush3.bf16.msra.mxu0 %v988_v62 }
  0xb6   : > { %990 = vmatprep.subr.bf16.mxu0 %v1280_v0 }
  0xb9   : > { %992 = vmatpush3.bf16.msra.mxu0 %v991_v2 }
  0xba   : > { %993 = vmatprep.subr.bf16.mxu0 %v1280_v0 }
  0xbd   : > { %995 = vmatpush3.bf16.msra.mxu0 %v994_v5 }
  0xbe   : > { %996 = vmatprep.subr.bf16.mxu0 %v1280_v0 }
  0xc1   : > { %998 = vmatpush3.bf16.msra.mxu0 %v997_v15 }
  0xc2   : > { %999 = vmatprep.subr.bf16.mxu0 %v1280_v0 }
  0xc5   : > { %1001 = vmatpush3.bf16.msra.mxu0 %v1000_v18 }
 0x17b   : > { %v421_v7 = vpop.f32.mrb[0].mxu0 }
 0x17c   : > { %v431_v9 = vmul.f32 %v764_v6, %v421_v7  ;;  %v859_v10 = vpop.f32.mrb[1].mxu0 }
 0x17e   : > { %v436_v11 = vadd.f32 %v765_v8, %v431_v9 }
 0x180   : > { %v437_v12 = vmax.f32 %v436_v11, 0.0 }
 0x182   : > { %893 = vmatmul.mubr.f32.vlgmr.msra.gmra.mrb[0].mxu1 %v437_v12 }
 0x255   : > { %v520_v20 = vpop.f32.mrb[0].mxu1 }
 0x256   : > { %v530_v22 = vmul.f32 %v766_v19, %v520_v20  ;;  %v894_v23 = vpop.f32.mrb[1].mxu1 }
 0x258   : > { %v535_v24 = vadd.f32 %v767_v21, %v530_v22 }
 0x25a   : > { %v536_v0 = vmax.f32 %v535_v24, 0.0 }
 0x25c   : > { %928 = vmatmul.mubr.f32.vlgmr.msra.gmra.mrb[2].mxu0 %v536_v0 }
 0x32f   : > { %v619_v26 = vpop.f32.mrb[2].mxu0 }
 0x330   : > { %v629_v28 = vmul.f32 %v768_v25, %v619_v26  ;;  %v929_v29 = vpop.f32.mrb[3].mxu0 }
 0x332   : > { %v634_v30 = vadd.f32 %v769_v27, %v629_v28 }
 0x334   : > { %v635_v31 = vmax.f32 %v634_v30, 0.0 }
 0x336   : > { %636 = vst [vmem:[%s337_s30] sm:$0xff] %v635_v31 }
 0x337   : > { %1211 = shalt.err (!%p1208_p4)
}
 0x338   : > { %s1212_s8 = scalar_lea.hbm %s1598_s11, 128  ;;  %s1216_s12 = scalar_lea.hbm %s1649_s7, 256 }
 0x339   : > { %p1213_p0 = scmp.ne.s32.totalorder %s1598_s11, %s1212_s8  ;;  %p1217_p8 = scmp.lt.u32.totalorder %s1598_s11, %s1649_s7 }
 0x33a   : > { %p1218_p13 = scmp.lt.u32.totalorder %s1216_s12, %s1212_s8  ;;  %p1220_p10 = scmp.lt.u32.totalorder %s1212_s8, %s1598_s11 }
 0x33b   : > { %p1214_p9 = pnand %p1213_p0, %p1478_p5 }
 0x33c   : > { %p1219_p6 = por %p1218_p13, %p1217_p8 }
 0x33d   : > { %p1215_p11 = pneg %p1214_p9 }
 0x33e   : > { %p1221_p3 = por %p1220_p10, %p1219_p6 }
 0x340   : > { %p1222_p7 = pnand %p1221_p3, %p1215_p11 }
 0x342   : > { %1225 = shalt.err (!%p1222_p7)
}
 0x343   : > { %1016 = dma.vmem_to_hbm [thread:$0]  (%p1478_p5), %s1600_s9, 128, %s1598_s11, %s638_s14  }
 0x344 PF: > { %s1669_s30 = sld [smem:[#allocation15_spill]]  ;;  %s663_s23 = sand.u32 1, %s1260_s24  }
 0x345   : > { %p1671_p1 = scmp.ge.s32.totalorder %s1272_s27, 2  ;;  %s664_s10 = scalar_lea.sflag [#allocation4], %s663_s23 }
 0x34a   : > { %p1670_p12 = scmp.ne.s32.totalorder %s1669_s30, 0 }
 0x34c   : > { %p1033_p2 = pnand %p1671_p1, %p1670_p12 }
 0x34e   : > { %1255 = dma.done.wait (!%p1033_p2), %s664_s10, 128  }
 0x34f   : > { %1257 = vsyncadd (!%p1033_p2), %s664_s10, 4294967168  ;;  %p22_p4 = scmp.ge.s32.totalorder %s1464_s22, 4   ;;  %s1672_s24 = smov %s1264_s25 }
 0x350   : > { %s1673_s25 = smov %s1268_s26  ;;  %s1674_s26 = smov %s1474_s18 }
 0x351   : > { %s1675_s27 = smov %s1464_s22  ;;  %24 = sbr.rel (!%p22_p4) target bundleno = 7 (0x7), region = 105 }
 0x358   :  { %669 = vsyncpa [#allocation3], 1 }
 0x359   :  { %671 = vsyncpa [#allocation3 + $0x1], 1 }
 0x35a   :  { %672 = vsyncpa [#allocation6], 1 }
 0x35b   :  { %673 = vsyncpa [#allocation9], 1 }
 0x35c   :  { %674 = vsyncpa [#allocation4], 1 }
 0x35d   :  { %676 = vsyncpa [#allocation4 + $0x1], 1 }

</bundles_post_ra>
